<compile_context>
chip_gen: v5e
topology: v5e:2x2
jax: 0.10.0
libtpu: 0.0.40
codegen_flags: <defaults>
</compile_context>

<pallas_src>
import functools

import jax
import jax.numpy as jnp
from jax.experimental import pallas as pl
from jax.experimental.pallas import tpu as pltpu


def _koopman_loss_kernel(c_recon, c_pred, c_lin, c_noise,
                         x_ref, xr_ref, xp_ref, y_ref,
                         xk_ref, xpe_ref, ye_ref,
                         out_ref, acc_ref):
    part = pl.program_id(0)
    step = pl.program_id(1)

    # ---- init running accumulator at the first step of this partition ------
    @pl.when(step == 0)
    def _init():
        acc_ref[...] = jnp.zeros_like(acc_ref)

    # ---- latent MAE terms: computed exactly once (part 0, step 0) ----------
    @pl.when(jnp.logical_and(part == 0, step == 0))
    def _latent():
        ye = ye_ref[...].astype(jnp.float32)
        lin = jnp.sum(jnp.abs(xk_ref[...].astype(jnp.float32) - ye))
        noise = jnp.sum(jnp.abs(xpe_ref[...].astype(jnp.float32) - ye))
        acc_ref[...] += c_lin * lin + c_noise * noise

    # ---- MSE terms: Frobenius norm over H*W per row (= per (b,c)) ----------
    # Cast to f32 in-VMEM (inputs arrive in native dtype; HBM bytes halved
    # for bf16 inputs).  Zero-padded rows contribute sqrt(0) = 0.
    d_recon = x_ref[...].astype(jnp.float32) - xr_ref[...].astype(jnp.float32)
    fro_recon = jnp.sum(
        jnp.sqrt(jnp.sum(d_recon * d_recon, axis=-1, keepdims=True)))
    d_pred = xp_ref[...].astype(jnp.float32) - y_ref[...].astype(jnp.float32)
    fro_pred = jnp.sum(
        jnp.sqrt(jnp.sum(d_pred * d_pred, axis=-1, keepdims=True)))
    acc_ref[...] += c_recon * fro_recon + c_pred * fro_pred

    # ---- finalize: write this partition's partial scalar once --------------
    @pl.when(step == pl.num_programs(1) - 1)
    def _finalize():
        out_ref[...] = acc_ref[...]


def koopman_vit_loss(x, y, x_predicted, y_encoded, x_predicted_encoded,
                     x_encoded_koopman, x_recon, *, a1, a2, a3, a4):
    """Pallas implementation of KoopmanViTLoss.forward (returns a scalar)."""
    B, C, H, W = x.shape
    Bl, D = y_encoded.shape
    R, L = B * C, H * W
    itemsize = jnp.dtype(x.dtype).itemsize
    lat_itemsize = jnp.dtype(y_encoded.dtype).itemsize

    # ---- row-tile selection: ~2 MiB per image tile ------------------------
    budget_bytes = 2 * 1024 * 1024
    tr = max(8, (budget_bytes // max(1, L * itemsize)) // 8 * 8)
    r_ceil8 = ((R + 7) // 8) * 8
    tr = min(tr, r_ceil8)

    n_tiles = -(-R // tr)                     # ceil(R / tr)
    num_parts = 2 if n_tiles >= 2 else 1      # split across v7x's 2 TCs
    n_tiles = -(-n_tiles // num_parts) * num_parts
    inner = n_tiles // num_parts
    r_pad = n_tiles * tr

    # Glue: NCHW -> (B*C, H*W); zero-pad rows to a multiple of the tiling
    # (zero rows contribute 0 to the Frobenius sum).  Native dtype preserved.
    def flat(img):
        img2 = img.reshape(R, L)
        if r_pad != R:
            img2 = jnp.pad(img2, ((0, r_pad - R), (0, 0)))
        return img2

    x2, xr2, xp2, y2 = flat(x), flat(x_recon), flat(x_predicted), flat(y)

    # Fold the means into the coefficients so the kernel only accumulates sums.
    c_recon = float(a1) / float(R)
    c_pred = float(a2) / float(R)
    c_lin = float(a3) / float(Bl)
    c_noise = float(a4) / float(Bl)

    img_spec = pl.BlockSpec((tr, L), lambda p, i: (p * inner + i, 0))
    lat_spec = pl.BlockSpec((Bl, D), lambda p, i: (0, 0))
    out_spec = pl.BlockSpec((1, 1), lambda p, i: (p, 0))

    tile_bytes = tr * L * itemsize
    lat_bytes = Bl * D * lat_itemsize
    vmem_need = 4 * 2 * tile_bytes + 3 * 2 * lat_bytes + (4 << 20)
    vmem_limit = int(min(max(vmem_need, 32 << 20), 48 << 20))

    cost = pl.CostEstimate(
        flops=int(6 * r_pad * L + 6 * Bl * D),
        transcendentals=int(2 * r_pad),
        bytes_accessed=int(4 * r_pad * L * itemsize + 3 * Bl * D * lat_itemsize),
    )

    kernel = functools.partial(_koopman_loss_kernel,
                               c_recon, c_pred, c_lin, c_noise)

    partials = pl.pallas_call(
        kernel,
        out_shape=jax.ShapeDtypeStruct((num_parts, 1), jnp.float32),
        grid_spec=pltpu.PrefetchScalarGridSpec(
            num_scalar_prefetch=0,
            grid=(num_parts, inner),
            in_specs=[img_spec, img_spec, img_spec, img_spec,
                      lat_spec, lat_spec, lat_spec],
            out_specs=out_spec,
            scratch_shapes=[pltpu.VMEM((1, 1), jnp.float32)]),
        compiler_params=pltpu.CompilerParams(
            dimension_semantics=("parallel", "arbitrary"),
            vmem_limit_bytes=vmem_limit),
        cost_estimate=cost,
    )(x2, xr2, xp2, y2, x_encoded_koopman, x_predicted_encoded, y_encoded)

    return jnp.sum(partials)


def _reference_loss(x, y, x_predicted, y_encoded, x_predicted_encoded,
                    x_encoded_koopman, x_recon, a1, a2, a3, a4):
    """Pure-JAX reference mirroring the PyTorch module."""
    def mse(p, q):
        n = jnp.sqrt(jnp.sum((p - q) ** 2, axis=(2, 3)))   # (B, C)
        return jnp.mean(jnp.mean(n, axis=1))

    def mae(p, q):
        return jnp.mean(jnp.sum(jnp.abs(p - q), axis=1))

    return (a1 * mse(x, x_recon) + a2 * mse(x_predicted, y)
            + a3 * mae(x_encoded_koopman, y_encoded)
            + a4 * mae(x_predicted_encoded, y_encoded))


if __name__ == "__main__":
    # Deterministic loss coefficients (module __init__ args).
    a1, a2, a3, a4 = 1.0, 0.5, 0.25, 0.125

    B, C, H, W = 2, 4, 16, 16   # image tensors  (NCHW)
    D = 32                      # latent dim for encoded tensors

    key = jax.random.PRNGKey(0)
    ks = jax.random.split(key, 7)
    x = jax.random.normal(ks[0], (B, C, H, W), jnp.float32)
    y = jax.random.normal(ks[1], (B, C, H, W), jnp.float32)
    x_predicted = jax.random.normal(ks[2], (B, C, H, W), jnp.float32)
    x_recon = jax.random.normal(ks[3], (B, C, H, W), jnp.float32)
    y_encoded = jax.random.normal(ks[4], (B, D), jnp.float32)
    x_predicted_encoded = jax.random.normal(ks[5], (B, D), jnp.float32)
    x_encoded_koopman = jax.random.normal(ks[6], (B, D), jnp.float32)

    loss = koopman_vit_loss(
        x, y, x_predicted, y_encoded, x_predicted_encoded,
        x_encoded_koopman, x_recon, a1=a1, a2=a2, a3=a3, a4=a4)
    loss = jax.block_until_ready(loss)

    ref = _reference_loss(x, y, x_predicted, y_encoded, x_predicted_encoded,
                          x_encoded_koopman, x_recon, a1, a2, a3, a4)
    assert jnp.allclose(loss, ref, rtol=1e-5, atol=1e-5), (loss, ref)

    print("KERNEL_OK")
</pallas_src>

<mosaic_0001>
module attributes {stable_mosaic.version = 11 : i64} {
  func.func @_koopman_loss_kernel(%arg0: i32, %arg1: i32, %arg2: memref<8x256xf32, #tpu.memory_space<vmem>>, %arg3: memref<8x256xf32, #tpu.memory_space<vmem>>, %arg4: memref<8x256xf32, #tpu.memory_space<vmem>>, %arg5: memref<8x256xf32, #tpu.memory_space<vmem>>, %arg6: memref<2x32xf32, #tpu.memory_space<vmem>>, %arg7: memref<2x32xf32, #tpu.memory_space<vmem>>, %arg8: memref<2x32xf32, #tpu.memory_space<vmem>>, %arg9: memref<1x1xf32, #tpu.memory_space<vmem>>, %arg10: memref<1x1xf32, #tpu.memory_space<vmem>>) attributes {dimension_semantics = [#tpu.dimension_semantics<parallel>, #tpu.dimension_semantics<arbitrary>], iteration_bounds = array<i64: 1, 1>, scalar_prefetch = 0 : i64, scratch_operands = 1 : i64, tpu.core_type = #tpu.core_type<tc>, window_params = [{transform_indices = @transform_0, window_bounds = array<i64: 8, 256>}, {transform_indices = @transform_1, window_bounds = array<i64: 8, 256>}, {transform_indices = @transform_2, window_bounds = array<i64: 8, 256>}, {transform_indices = @transform_3, window_bounds = array<i64: 8, 256>}, {pipeline_mode = #tpu.pipeline_mode<synchronous>, transform_indices = @transform_4, window_bounds = array<i64: 2, 32>}, {pipeline_mode = #tpu.pipeline_mode<synchronous>, transform_indices = @transform_5, window_bounds = array<i64: 2, 32>}, {pipeline_mode = #tpu.pipeline_mode<synchronous>, transform_indices = @transform_6, window_bounds = array<i64: 2, 32>}, {transform_indices = @transform_7, window_bounds = array<i64: 1, 1>}]} {
    %c0_i32 = arith.constant 0 : i32
    %0 = arith.cmpi eq, %arg1, %c0_i32 : i32
    %1 = arith.extui %0 : i1 to i32
    %c0_i32_0 = arith.constant 0 : i32
    %2 = arith.cmpi ne, %1, %c0_i32_0 : i32
    scf.if %2 {
      %cst_22 = arith.constant 0.000000e+00 : f32
      %40 = vector.broadcast %cst_22 : f32 to vector<1x1xf32>
      %c0_23 = arith.constant 0 : index
      %c0_24 = arith.constant 0 : index
      %41 = vector.load %arg10[%c0_23, %c0_24] : memref<1x1xf32, #tpu.memory_space<vmem>>, vector<1x1xf32>
      tpu.vector_store %arg10[%c0_23, %c0_24], %40 {strides = array<i32>} : memref<1x1xf32, #tpu.memory_space<vmem>>, vector<1x1xf32>,
    } else {
    }
    %c0_i32_1 = arith.constant 0 : i32
    %3 = arith.cmpi eq, %arg0, %c0_i32_1 : i32
    %c0_i32_2 = arith.constant 0 : i32
    %4 = arith.cmpi eq, %arg1, %c0_i32_2 : i32
    %5 = arith.andi %3, %4 : i1
    %6 = arith.extui %5 : i1 to i32
    %c0_i32_3 = arith.constant 0 : i32
    %7 = arith.cmpi ne, %6, %c0_i32_3 : i32
    scf.if %7 {
      %c0_22 = arith.constant 0 : index
      %c0_23 = arith.constant 0 : index
      %40 = vector.load %arg8[%c0_22, %c0_23] : memref<2x32xf32, #tpu.memory_space<vmem>>, vector<2x32xf32>
      %c0_24 = arith.constant 0 : index
      %c0_25 = arith.constant 0 : index
      %41 = vector.load %arg6[%c0_24, %c0_25] : memref<2x32xf32, #tpu.memory_space<vmem>>, vector<2x32xf32>
      %42 = arith.subf %41, %40 : vector<2x32xf32>
      %43 = math.absf %42 : vector<2x32xf32>
      %44 = vector.shape_cast %43 : vector<2x32xf32> to vector<1x2x32xf32>
      %cst_26 = arith.constant dense<0.000000e+00> : vector<1xf32>
      %45 = vector.multi_reduction <add>, %44, %cst_26 [1, 2] : vector<1x2x32xf32> to vector<1xf32>
      %46 = vector.shape_cast %45 : vector<1xf32> to vector<1x1x1xf32>
      %47 = vector.extract %46[0, 0, 0] : f32 from vector<1x1x1xf32>
      %c0_27 = arith.constant 0 : index
      %c0_28 = arith.constant 0 : index
      %48 = vector.load %arg7[%c0_27, %c0_28] : memref<2x32xf32, #tpu.memory_space<vmem>>, vector<2x32xf32>
      %49 = arith.subf %48, %40 : vector<2x32xf32>
      %50 = math.absf %49 : vector<2x32xf32>
      %51 = vector.shape_cast %50 : vector<2x32xf32> to vector<1x2x32xf32>
      %cst_29 = arith.constant dense<0.000000e+00> : vector<1xf32>
      %52 = vector.multi_reduction <add>, %51, %cst_29 [1, 2] : vector<1x2x32xf32> to vector<1xf32>
      %53 = vector.shape_cast %52 : vector<1xf32> to vector<1x1x1xf32>
      %54 = vector.extract %53[0, 0, 0] : f32 from vector<1x1x1xf32>
      %c0_30 = arith.constant 0 : index
      %c0_31 = arith.constant 0 : index
      %55 = vector.load %arg10[%c0_30, %c0_31] : memref<1x1xf32, #tpu.memory_space<vmem>>, vector<1x1xf32>
      %cst_32 = arith.constant 1.250000e-01 : f32
      %56 = arith.mulf %cst_32, %47 : f32
      %cst_33 = arith.constant 6.250000e-02 : f32
      %57 = arith.mulf %cst_33, %54 : f32
      %58 = arith.addf %56, %57 : f32
      %59 = vector.broadcast %58 : f32 to vector<1x1xf32>
      %60 = arith.addf %55, %59 : vector<1x1xf32>
      %c0_34 = arith.constant 0 : index
      %c0_35 = arith.constant 0 : index
      %61 = vector.load %arg10[%c0_34, %c0_35] : memref<1x1xf32, #tpu.memory_space<vmem>>, vector<1x1xf32>
      tpu.vector_store %arg10[%c0_34, %c0_35], %60 {strides = array<i32>} : memref<1x1xf32, #tpu.memory_space<vmem>>, vector<1x1xf32>,
    } else {
    }
    %c0 = arith.constant 0 : index
    %c0_4 = arith.constant 0 : index
    %8 = vector.load %arg2[%c0, %c0_4] : memref<8x256xf32, #tpu.memory_space<vmem>>, vector<8x256xf32>
    %c0_5 = arith.constant 0 : index
    %c0_6 = arith.constant 0 : index
    %9 = vector.load %arg3[%c0_5, %c0_6] : memref<8x256xf32, #tpu.memory_space<vmem>>, vector<8x256xf32>
    %10 = arith.subf %8, %9 : vector<8x256xf32>
    %11 = arith.mulf %10, %10 : vector<8x256xf32>
    %cst = arith.constant dense<0.000000e+00> : vector<8xf32>
    %12 = vector.multi_reduction <add>, %11, %cst [1] : vector<8x256xf32> to vector<8xf32>
    %13 = vector.shape_cast %12 : vector<8xf32> to vector<8x1xf32>
    %14 = math.sqrt %13 : vector<8x1xf32>
    %15 = vector.shape_cast %14 : vector<8x1xf32> to vector<1x8x1xf32>
    %cst_7 = arith.constant dense<0.000000e+00> : vector<1xf32>
    %16 = vector.multi_reduction <add>, %15, %cst_7 [1, 2] : vector<1x8x1xf32> to vector<1xf32>
    %17 = vector.shape_cast %16 : vector<1xf32> to vector<1x1x1xf32>
    %18 = vector.extract %17[0, 0, 0] : f32 from vector<1x1x1xf32>
    %c0_8 = arith.constant 0 : index
    %c0_9 = arith.constant 0 : index
    %19 = vector.load %arg4[%c0_8, %c0_9] : memref<8x256xf32, #tpu.memory_space<vmem>>, vector<8x256xf32>
    %c0_10 = arith.constant 0 : index
    %c0_11 = arith.constant 0 : index
    %20 = vector.load %arg5[%c0_10, %c0_11] : memref<8x256xf32, #tpu.memory_space<vmem>>, vector<8x256xf32>
    %21 = arith.subf %19, %20 : vector<8x256xf32>
    %22 = arith.mulf %21, %21 : vector<8x256xf32>
    %cst_12 = arith.constant dense<0.000000e+00> : vector<8xf32>
    %23 = vector.multi_reduction <add>, %22, %cst_12 [1] : vector<8x256xf32> to vector<8xf32>
    %24 = vector.shape_cast %23 : vector<8xf32> to vector<8x1xf32>
    %25 = math.sqrt %24 : vector<8x1xf32>
    %26 = vector.shape_cast %25 : vector<8x1xf32> to vector<1x8x1xf32>
    %cst_13 = arith.constant dense<0.000000e+00> : vector<1xf32>
    %27 = vector.multi_reduction <add>, %26, %cst_13 [1, 2] : vector<1x8x1xf32> to vector<1xf32>
    %28 = vector.shape_cast %27 : vector<1xf32> to vector<1x1x1xf32>
    %29 = vector.extract %28[0, 0, 0] : f32 from vector<1x1x1xf32>
    %c0_14 = arith.constant 0 : index
    %c0_15 = arith.constant 0 : index
    %30 = vector.load %arg10[%c0_14, %c0_15] : memref<1x1xf32, #tpu.memory_space<vmem>>, vector<1x1xf32>
    %cst_16 = arith.constant 1.250000e-01 : f32
    %31 = arith.mulf %cst_16, %18 : f32
    %cst_17 = arith.constant 6.250000e-02 : f32
    %32 = arith.mulf %cst_17, %29 : f32
    %33 = arith.addf %31, %32 : f32
    %34 = vector.broadcast %33 : f32 to vector<1x1xf32>
    %35 = arith.addf %30, %34 : vector<1x1xf32>
    %c0_18 = arith.constant 0 : index
    %c0_19 = arith.constant 0 : index
    %36 = vector.load %arg10[%c0_18, %c0_19] : memref<1x1xf32, #tpu.memory_space<vmem>>, vector<1x1xf32>
    tpu.vector_store %arg10[%c0_18, %c0_19], %35 {strides = array<i32>} : memref<1x1xf32, #tpu.memory_space<vmem>>, vector<1x1xf32>,
    %c0_i32_20 = arith.constant 0 : i32
    %37 = arith.cmpi eq, %arg1, %c0_i32_20 : i32
    %38 = arith.extui %37 : i1 to i32
    %c0_i32_21 = arith.constant 0 : i32
    %39 = arith.cmpi ne, %38, %c0_i32_21 : i32
    scf.if %39 {
      %c0_22 = arith.constant 0 : index
      %c0_23 = arith.constant 0 : index
      %40 = vector.load %arg10[%c0_22, %c0_23] : memref<1x1xf32, #tpu.memory_space<vmem>>, vector<1x1xf32>
      %c0_24 = arith.constant 0 : index
      %c0_25 = arith.constant 0 : index
      %41 = vector.load %arg9[%c0_24, %c0_25] : memref<1x1xf32, #tpu.memory_space<vmem>>, vector<1x1xf32>
      tpu.vector_store %arg9[%c0_24, %c0_25], %40 {strides = array<i32>} : memref<1x1xf32, #tpu.memory_space<vmem>>, vector<1x1xf32>,
    } else {
    }
    return
  }
  func.func @transform_0(%arg0: i32, %arg1: i32) -> (i32, i32) {
    %c1_i32 = arith.constant 1 : i32
    %0 = arith.muli %arg0, %c1_i32 : i32
    %1 = arith.addi %0, %arg1 : i32
    %c0_i32 = arith.constant 0 : i32
    %c0_i32_0 = arith.constant 0 : i32
    return %1, %c0_i32 : i32, i32
  }
  func.func @transform_1(%arg0: i32, %arg1: i32) -> (i32, i32) {
    %c1_i32 = arith.constant 1 : i32
    %0 = arith.muli %arg0, %c1_i32 : i32
    %1 = arith.addi %0, %arg1 : i32
    %c0_i32 = arith.constant 0 : i32
    %c0_i32_0 = arith.constant 0 : i32
    return %1, %c0_i32 : i32, i32
  }
  func.func @transform_2(%arg0: i32, %arg1: i32) -> (i32, i32) {
    %c1_i32 = arith.constant 1 : i32
    %0 = arith.muli %arg0, %c1_i32 : i32
    %1 = arith.addi %0, %arg1 : i32
    %c0_i32 = arith.constant 0 : i32
    %c0_i32_0 = arith.constant 0 : i32
    return %1, %c0_i32 : i32, i32
  }
  func.func @transform_3(%arg0: i32, %arg1: i32) -> (i32, i32) {
    %c1_i32 = arith.constant 1 : i32
    %0 = arith.muli %arg0, %c1_i32 : i32
    %1 = arith.addi %0, %arg1 : i32
    %c0_i32 = arith.constant 0 : i32
    %c0_i32_0 = arith.constant 0 : i32
    return %1, %c0_i32 : i32, i32
  }
  func.func @transform_4(%arg0: i32, %arg1: i32) -> (i32, i32) {
    %c0_i32 = arith.constant 0 : i32
    %c0_i32_0 = arith.constant 0 : i32
    %c0_i32_1 = arith.constant 0 : i32
    return %c0_i32, %c0_i32_0 : i32, i32
  }
  func.func @transform_5(%arg0: i32, %arg1: i32) -> (i32, i32) {
    %c0_i32 = arith.constant 0 : i32
    %c0_i32_0 = arith.constant 0 : i32
    %c0_i32_1 = arith.constant 0 : i32
    return %c0_i32, %c0_i32_0 : i32, i32
  }
  func.func @transform_6(%arg0: i32, %arg1: i32) -> (i32, i32) {
    %c0_i32 = arith.constant 0 : i32
    %c0_i32_0 = arith.constant 0 : i32
    %c0_i32_1 = arith.constant 0 : i32
    return %c0_i32, %c0_i32_0 : i32, i32
  }
  func.func @transform_7(%arg0: i32, %arg1: i32) -> (i32, i32) {
    %c0_i32 = arith.constant 0 : i32
    %c0_i32_0 = arith.constant 0 : i32
    return %arg0, %c0_i32 : i32, i32
  }
}

</mosaic_0001>

<bundles_post_ra>
// kernel: tpu_custom_call.1
= control target key start
LH: loop header
LB: loop body
LE: loop exit
PB: predicated region body
PF: predicated region fallthrough
CT: control target
= control target key end

     0   :  { %12 = vsyncpa [#allocation4], 0  ;;  %s507_s0 = inlined_call_operand.hbm [shape: f32[8,256], index: 0, kind: input, shape index: {}]   ;;  %s508_s1 = inlined_call_operand.hbm [shape: f32[8,256], index: 1, kind: input, shape index: {}]   ;;  %s509_s2 = inlined_call_operand.hbm [shape: f32[8,256], index: 2, kind: input, shape index: {}]   ;;  %s510_s3 = inlined_call_operand.hbm [shape: f32[8,256], index: 3, kind: input, shape index: {}]   ;;  %s511_s4 = inlined_call_operand.vmem [shape: f32[2,32], index: 4, kind: input, shape index: {}]   ;;  %s512_s5 = inlined_call_operand.vmem [shape: f32[2,32], index: 5, kind: input, shape index: {}]   ;;  %s513_s6 = inlined_call_operand.hbm [shape: f32[2,32], index: 6, kind: input, shape index: {}]   ;;  %s514_s7 = inlined_call_operand.hbm [shape: f32[1,1], index: 7, kind: output, shape index: {}]  }
   0x1   :  { %13 = vsyncpa [#allocation7], 0 }
   0x2   :  { %14 = vsyncpa [#allocation10], 0  ;;  %s40_s26 = sshll.u32 %s508_s1, 4  ;;  %s41_s26 = int_to_ptr.hbm [resolvable:$true] %s40_s26 }
   0x3   :  { %15 = vsyncpa [#allocation5], 0  ;;  %s432_s27 = smov [#allocation6]   ;;  %s70_s8 = sshll.u32 %s510_s3, 4  ;;  %s71_s8 = int_to_ptr.hbm [resolvable:$true] %s70_s8 }
   0x4   :  { %s42_s28 = sshll.u32 %s432_s27, 4  ;;  %s433_s9 = smov [#allocation9]   ;;  %s43_s28 = int_to_ptr.vmem [resolvable:$true] %s42_s28 }
   0x5   :  { %45 = dma.hbm_to_vmem [thread:$0]  %s41_s26, 256, %s43_s28, [#allocation7]  }
   0x6   :  { %s72_s10 = sshll.u32 %s433_s9, 4  ;;  %s25_s13 = sshll.u32 %s507_s0, 4  ;;  %s73_s10 = int_to_ptr.vmem [resolvable:$true] %s72_s10  ;;  %s26_s13 = int_to_ptr.hbm [resolvable:$true] %s25_s13 }
   0x7   :  { %75 = dma.hbm_to_vmem [thread:$0]  %s71_s8, 256, %s73_s10, [#allocation10]  }
   0x8   :  { %s55_s15 = sshll.u32 %s509_s2, 4  ;;  %s434_s16 = smov [#allocation3]   ;;  %s56_s15 = int_to_ptr.hbm [resolvable:$true] %s55_s15 }
   0x9   :  { %s27_s17 = sshll.u32 %s434_s16, 4  ;;  %s435_s3 = smov [#allocation8]   ;;  %s28_s17 = int_to_ptr.vmem [resolvable:$true] %s27_s17 }
   0xa   :  { %30 = dma.hbm_to_vmem [thread:$0]  %s26_s13, 256, %s28_s17, [#allocation4]  }
   0xb   :  { %s57_s18 = sshll.u32 %s435_s3, 4  ;;  %s85_s21 = sshll.u32 %s513_s6, 4  ;;  %s58_s18 = int_to_ptr.vmem [resolvable:$true] %s57_s18  ;;  %s86_s21 = int_to_ptr.hbm [resolvable:$true] %s85_s21 }
   0xc   :  { %60 = dma.hbm_to_vmem [thread:$0]  %s56_s15, 256, %s58_s18, [#allocation7]  }
   0xd   :  { %s436_s0 = smov [#allocation11]  }
   0xe   :  { %s87_s22 = sshll.u32 %s436_s0, 4  ;;  %s88_s22 = int_to_ptr.vmem [resolvable:$true] %s87_s22 }
   0xf   :  { %90 = dma.hbm_to_vmem [thread:$0]  %s86_s21, 32, %s88_s22, [#allocation10]  }
  0x10   :  { %424 = dma.done.wait [#allocation4], 256  }
  0x11   :  { %425 = vsyncadd [#allocation4], 4294967040 }
  0x12   :  { %426 = dma.done.wait [#allocation7], 512  }
  0x13   :  { %427 = vsyncadd [#allocation7], 4294966784 }
  0x14   :  { %428 = dma.done.wait [#allocation10], 288  }
  0x15   :  { %429 = vsyncadd [#allocation10], 4294967008  ;;  %v162_v0 = vld [vmem:[#allocation3] sm:$0xff]  ;;  %v163_v1 = vld [vmem:[#allocation3 + $0x8] sm:$0xff]  ;;  %vm130_vm0 = vcmask 254976   ;;  %vm185_vm2 = vcmask 7168  }
  0x16   :  { %v164_v2 = vld [vmem:[#allocation6] sm:$0xff]  ;;  %v165_v3 = vld [vmem:[#allocation6 + $0x8] sm:$0xff]  ;;  %v196_v5 = vld [vmem:[#allocation8] sm:$0xff]  ;;  %vm119_vm6 = vcmask 0   ;;  %s438_s10 = smov [#allocation12]   ;;  %s249_s1 = sshll.u32 %s514_s7, 4  ;;  %s250_s1 = int_to_ptr.hbm [resolvable:$true] %s249_s1 }
  0x17   :  { %v166_v4 = vsub.f32 %v162_v0, %v164_v2  ;;  %v197_v6 = vld [vmem:[#allocation8 + $0x8] sm:$0xff]  ;;  %v167_v7 = vsub.f32 %v163_v1, %v165_v3  ;;  %v198_v8 = vld [vmem:[#allocation9] sm:$0xff]  ;;  %v199_v9 = vld [vmem:[#allocation9 + $0x8] sm:$0xff]  ;;  %v437_v1 = vmov 0.0   ;;  %s247_s11 = sshll.u32 %s438_s10, 4  ;;  %s248_s11 = int_to_ptr.vmem [resolvable:$true] %s247_s11 }
  0x18   :  { %v126_v10 = vld [vmem:[#allocation11] sm:$0x3]  ;;  %v200_v14 = vsub.f32 %v196_v5, %v198_v8  ;;  %v201_v15 = vsub.f32 %v197_v6, %v199_v9  ;;  %120 = vst.msk [vmem:[#allocation2] sm:$0x1] %vm119_vm6, %v437_v1 }
  0x19   :  { %v168_v11 = vmul.f32 %v166_v4, %v166_v4  ;;  %v127_v12 = vld [vmem:[%s511_s4] sm:$0x3]  ;;  %v169_v13 = vmul.f32 %v167_v7, %v167_v7 }
  0x1a   :  { %v128_v16 = vsub.f32 %v127_v12, %v126_v10  ;;  %v202_v19 = vmul.f32 %v200_v14, %v200_v14  ;;  %v203_v20 = vmul.f32 %v201_v15, %v201_v15  ;;  %v141_v23 = vld [vmem:[%s512_s5] sm:$0x3] }
  0x1b   :  { %v170_v17 = vadd.f32 %v169_v13, %v168_v11  ;;  %v142_v24 = vsub.f32 %v141_v23, %v126_v10 }
  0x1c   :  { %v129_v18 = vand.u32 2147483647, %v128_v16  ;;  %v204_v22 = vadd.f32 %v203_v20, %v202_v19 }
  0x1d   :  { %171 = vadd.xlane.f32.xlu0 %v170_v17  ;;  %v143_v25 = vand.u32 2147483647, %v142_v24 }
  0x1e   :  { %v131_v21 = vsel %vm130_vm0, %v129_v18, 0.0 }
  0x1f   :  { %132 = vadd.xlane.f32.xlu1 %v131_v21  ;;  %v144_v26 = vsel %vm130_vm0, %v143_v25, 0.0  ;;  %v154_v15 = vld [vmem:[#allocation2] sm:$0x1] }
  0x25   :  { %205 = vadd.xlane.f32.xlu0 %v204_v22 }
  0x27   :  { %145 = vadd.xlane.f32.xlu1 %v144_v26 }
  0x90   :  { %v172_v27 = vpop.xlane.xlu0 %171 }
  0x91   :  { %276 = vrsqrt.f32 %v172_v27  ;;  %vm180_vm1 = vcmp.eq.f32.partialorder %v172_v27, inf  ;;  %v183_v39 = vand.u32 2147483648, %v172_v27  ;;  %vm182_vm3 = vcmp.eq.f32.partialorder %v172_v27, 0.0 }
  0x92   :  { %v133_v51 = vpop.xlane.xlu1 %132 }
  0x93   :  { %v134_v52 = vrot.slane %v133_v51, 4 }
  0x95   :  { %v135_v53 = vadd.f32 %v134_v52, %v133_v51 }
  0x97   :  { %v277_v28 = vpop.eup %276  ;;  %v136_v54 = vrot.slane %v135_v53, 2 }
  0x98   :  { %v206_v29 = vpop.xlane.xlu0 %205  ;;  %v174_v30 = vmul.f32 %v277_v28, %v172_v27 }
  0x99   :  { %278 = vrsqrt.f32 %v206_v29  ;;  %vm214_vm4 = vcmp.eq.f32.partialorder %v206_v29, inf  ;;  %v217_v47 = vand.u32 2147483648, %v206_v29  ;;  %vm216_vm5 = vcmp.eq.f32.partialorder %v206_v29, 0.0 }
  0x9a   :  { %v175_v31 = vmul.f32 %v277_v28, %v174_v30  ;;  %v137_v55 = vadd.f32 %v136_v54, %v135_v53  ;;  %v146_v58 = vpop.xlane.xlu1 %145 }
  0x9b   :  { %v147_v59 = vrot.slane %v146_v58, 4 }
  0x9c   :  { %v176_v32 = vmul.f32 0.5, %v175_v31  ;;  %v138_v56 = vrot.slane %v137_v55, 1 }
  0x9d   :  { %v148_v60 = vadd.f32 %v147_v59, %v146_v58 }
  0x9e   :  { %v177_v33 = vsub.f32 1.5, %v176_v32  ;;  %v139_v57 = vadd.f32 %v138_v56, %v137_v55 }
  0x9f   :  { %v279_v34 = vpop.eup %278  ;;  %v149_v61 = vrot.slane %v148_v60, 2 }
  0xa0   :  { %v208_v35 = vmul.f32 %v279_v34, %v206_v29  ;;  %v178_v36 = vmul.f32 %v277_v28, %v177_v33  ;;  %261 = vpush %v139_v57 }
  0xa1   :  { %v150_v62 = vadd.f32 %v149_v61, %v148_v60 }
  0xa2   :  { %v179_v37 = vmul.f32 %v178_v36, %v172_v27  ;;  %v209_v38 = vmul.f32 %v279_v34, %v208_v35 }
  0xa3   :  { %v151_v63 = vrot.slane %v150_v62, 1 }
  0xa4   :  { %v181_v40 = vsel %vm180_vm1, %v172_v27, %v179_v37  ;;  %v210_v41 = vmul.f32 0.5, %v209_v38 }
  0xa5   :  { %v184_v42 = vsel %vm182_vm3, %v183_v39, %v181_v40  ;;  %v152_v0 = vadd.f32 %v151_v63, %v150_v62 }
  0xa6   :  { %v186_v43 = vsel %vm185_vm2, %v184_v42, 0.0  ;;  %v211_v44 = vsub.f32 1.5, %v210_v41 }
  0xa7   :  { %187 = vadd.xlane.f32.xlu2 %v186_v43  ;;  %263 = vpush %v152_v0 }
  0xa8   :  { %v212_v45 = vmul.f32 %v279_v34, %v211_v44 }
  0xaa   :  { %v213_v46 = vmul.f32 %v212_v45, %v206_v29 }
  0xac   :  { %v215_v48 = vsel %vm214_vm4, %v206_v29, %v213_v46 }
  0xad   :  { %v218_v49 = vsel %vm216_vm5, %v217_v47, %v215_v48 }
  0xae   :  { %v219_v50 = vsel %vm185_vm2, %v218_v49, 0.0 }
  0xaf   :  { %220 = vadd.xlane.f32.xlu2 %v219_v50 }
  0xd1   :  { %s262_s4 = spop %261 }
  0xd2   :  { %s155_s5 = smul.f32 0.125, %s262_s4 }
  0xd8   :  { %s264_s25 = spop %263 }
  0xd9   :  { %s156_s26 = smul.f32 0.0625, %s264_s25 }
  0xdb   :  { %s157_s27 = sadd.f32 %s156_s26, %s155_s5 }
  0xdd   :  { %v158_v17 = vstv %s157_s27 }
  0xde   :  { %v159_v18 = vadd.f32 %v158_v17, %v154_v15 }
  0xe0   :  { %161 = vst.msk [vmem:[#allocation2] sm:$0x1] %vm119_vm6, %v159_v18 }
  0xe7   :  { %v229_v19 = vld [vmem:[#allocation2] sm:$0x1] }
 0x11a   :  { %v188_v2 = vpop.xlane.xlu2 %187 }
 0x11b   :  { %v189_v3 = vrot.slane %v188_v2, 4 }
 0x11d   :  { %v190_v4 = vadd.f32 %v189_v3, %v188_v2 }
 0x11f   :  { %v191_v5 = vrot.slane %v190_v4, 2 }
 0x121   :  { %v192_v6 = vadd.f32 %v191_v5, %v190_v4 }
 0x122   :  { %v221_v7 = vpop.xlane.xlu2 %220 }
 0x123   :  { %v222_v8 = vrot.slane %v221_v7, 4  ;;  %v193_v9 = vrot.slane %v192_v6, 1 }
 0x125   :  { %v223_v10 = vadd.f32 %v222_v8, %v221_v7  ;;  %v194_v11 = vadd.f32 %v193_v9, %v192_v6 }
 0x127   :  { %v224_v12 = vrot.slane %v223_v10, 2  ;;  %265 = vpush %v194_v11 }
 0x129   :  { %v225_v13 = vadd.f32 %v224_v12, %v223_v10 }
 0x12b   :  { %v226_v14 = vrot.slane %v225_v13, 1 }
 0x12d   :  { %v227_v16 = vadd.f32 %v226_v14, %v225_v13 }
 0x12f   :  { %267 = vpush %v227_v16 }
 0x158   :  { %s266_s28 = spop %265 }
 0x159   :  { %s230_s29 = smul.f32 0.125, %s266_s28 }
 0x160   :  { %s268_s30 = spop %267 }
 0x161   :  { %s231_s8 = smul.f32 0.0625, %s268_s30 }
 0x163   :  { %s232_s9 = sadd.f32 %s231_s8, %s230_s29 }
 0x165   :  { %v233_v20 = vstv %s232_s9 }
 0x166   :  { %v234_v21 = vadd.f32 %v233_v20, %v229_v19 }
 0x168   :  { %236 = vst.msk [vmem:[#allocation2] sm:$0x1] %vm119_vm6, %v234_v21 }
 0x16f   :  { %v240_v22 = vld [vmem:[#allocation2] sm:$0x1] }
 0x170   :  { %241 = vst.msk [vmem:[#allocation12] sm:$0x1] %vm119_vm6, %v240_v22 }
 0x171   :  { %252 = dma.vmem_to_hbm [thread:$0]  %s248_s11, 16, %s250_s1, [#allocation5]  }
 0x172   :  { %430 = dma.done.wait [#allocation5], 16  }
 0x173   :  { %431 = vsyncadd [#allocation5], 4294967280 }
 0x174   :  { %257 = vsyncpa [#allocation4], 1 }
 0x175   :  { %258 = vsyncpa [#allocation7], 1 }
 0x176   :  { %259 = vsyncpa [#allocation10], 1 }
 0x177   :  { %260 = vsyncpa [#allocation5], 1 }

</bundles_post_ra>
